<compile_context>
chip_gen: v7x
topology: tpu7x:2x2x1
jax: 0.10.0
libtpu: 0.0.40
codegen_flags: <defaults>
</compile_context>

<pallas_src>
import jax
import jax.numpy as jnp
from jax import lax
from jax.experimental import pallas as pl
from jax.experimental.pallas import tpu as pltpu


def _round_up(x, m):
    return (x + m - 1) // m * m


def _linear_kernel_single_k(x_ref, w_ref, b_ref, o_ref):
    """Single-K-tile path: out = x @ W^T + b in one shot (no scratch).

    x_ref: [tm, d_pad], w_ref: [n_pad, d_pad], b_ref: [1, n_pad],
    o_ref: [tm, n_pad].
    """
    acc = lax.dot_general(
        x_ref[...], w_ref[...],
        dimension_numbers=(((1,), (1,)), ((), ())),
        preferred_element_type=jnp.float32)
    o_ref[...] = (acc + b_ref[...].astype(jnp.float32)).astype(o_ref.dtype)


def _linear_kernel_multi_k(x_ref, w_ref, b_ref, o_ref, acc_ref):
    """One (i, k) grid step of out = x @ W^T + b with K-axis accumulation.

    x_ref:   [tm, tk]      activation tile
    w_ref:   [n_pad, tk]   weight tile, native nn.Linear [N, D] layout
    b_ref:   [1, n_pad]    lane-padded bias
    o_ref:   [tm, n_pad]   output tile (resident across k)
    acc_ref: [tm, n_pad]   f32 accumulator scratch
    """
    k = pl.program_id(1)

    @pl.when(k == 0)
    def _():
        # Fold bias into the accumulator init (no separate epilogue add).
        acc_ref[...] = jnp.broadcast_to(
            b_ref[...].astype(jnp.float32), acc_ref.shape)

    # Contract x dim 1 with w dim 1: [tm, tk] x [n_pad, tk] -> [tm, n_pad].
    acc_ref[...] += lax.dot_general(
        x_ref[...], w_ref[...],
        dimension_numbers=(((1,), (1,)), ((), ())),
        preferred_element_type=jnp.float32)

    @pl.when(k == pl.num_programs(1) - 1)
    def _():
        o_ref[...] = acc_ref[...].astype(o_ref.dtype)


def classifier_forward(x, weight, bias, *, tm=256, tk=512):
    """x: [B, 3, hidden, patch, patch] (any shape with leading batch dim).
    weight: [num_classes, D] (PyTorch nn.Linear layout), bias: [num_classes].
    Returns [B, num_classes]."""
    B = x.shape[0]
    x2d = x.reshape(B, -1)                       # torch-style flatten (plain JAX glue)
    D = x2d.shape[1]
    N = weight.shape[0]

    # Lane-dense output: pad N to a multiple of 128.
    n_pad = _round_up(N, 128)
    # Sublane-aligned M tile, lane-aligned K tile, clamped to the padded problem.
    tm = min(tm, _round_up(B, 8))
    tk = min(tk, _round_up(D, 128))
    b_pad = _round_up(B, tm)
    d_pad = _round_up(D, tk)

    x_p = x2d
    if (b_pad, d_pad) != (B, D):
        x_p = jnp.pad(x2d, ((0, b_pad - B), (0, d_pad - D)))
    w_p = weight
    if (n_pad, d_pad) != (N, D):
        w_p = jnp.pad(weight, ((0, n_pad - N), (0, d_pad - D)))
    b_p = jnp.pad(bias, (0, n_pad - N)).reshape(1, n_pad)

    grid_m = pl.cdiv(b_pad, tm)
    grid_k = pl.cdiv(d_pad, tk)
    itemsize = jnp.dtype(x2d.dtype).itemsize
    bytes_accessed = (x_p.size + w_p.size * grid_m
                      + n_pad + b_pad * n_pad) * itemsize
    cost = pl.CostEstimate(flops=2 * b_pad * d_pad * n_pad,
                           transcendentals=0,
                           bytes_accessed=bytes_accessed)

    if grid_k == 1:
        # Fast path: whole reduction in one tile -> no accumulator, no phases.
        out = pl.pallas_call(
            _linear_kernel_single_k,
            out_shape=jax.ShapeDtypeStruct((b_pad, n_pad), x2d.dtype),
            grid_spec=pltpu.PrefetchScalarGridSpec(
                num_scalar_prefetch=0,
                grid=(grid_m,),
                in_specs=[
                    pl.BlockSpec((tm, d_pad), lambda i: (i, 0)),      # activations
                    pl.BlockSpec((n_pad, d_pad), lambda i: (0, 0)),   # weight [N, D]
                    pl.BlockSpec((1, n_pad), lambda i: (0, 0)),       # bias
                ],
                out_specs=pl.BlockSpec((tm, n_pad), lambda i: (i, 0)),
            ),
            compiler_params=pltpu.CompilerParams(
                dimension_semantics=("parallel",)),
            cost_estimate=cost,
        )(x_p, w_p, b_p)
    else:
        out = pl.pallas_call(
            _linear_kernel_multi_k,
            out_shape=jax.ShapeDtypeStruct((b_pad, n_pad), x2d.dtype),
            grid_spec=pltpu.PrefetchScalarGridSpec(
                num_scalar_prefetch=0,
                grid=(grid_m, grid_k),
                in_specs=[
                    pl.BlockSpec((tm, tk), lambda i, k: (i, k)),      # activations
                    pl.BlockSpec((n_pad, tk), lambda i, k: (0, k)),   # weight [N, D]
                    pl.BlockSpec((1, n_pad), lambda i, k: (0, 0)),    # bias
                ],
                out_specs=pl.BlockSpec((tm, n_pad), lambda i, k: (i, 0)),
                scratch_shapes=[pltpu.VMEM((tm, n_pad), jnp.float32)],
            ),
            compiler_params=pltpu.CompilerParams(
                dimension_semantics=("parallel", "arbitrary")),
            cost_estimate=cost,
        )(x_p, w_p, b_p)

    # Strip lane / batch padding back to the logical result.
    return out[:B, :N]


def init_classifier_params(key, hidden_size, patch_size, num_classes,
                           dtype=jnp.float32):
    """Deterministic init matching nn.Linear's U(-1/sqrt(fan_in), 1/sqrt(fan_in))."""
    in_features = 3 * hidden_size * patch_size * patch_size
    kw, kb = jax.random.split(key)
    bound = 1.0 / (in_features ** 0.5)
    weight = jax.random.uniform(kw, (num_classes, in_features), dtype,
                                minval=-bound, maxval=bound)
    bias = jax.random.uniform(kb, (num_classes,), dtype,
                              minval=-bound, maxval=bound)
    return weight, bias


if __name__ == "__main__":
    # Small shapes consistent with the module.
    batch = 2
    hidden_size = 32
    patch_size = 2
    num_classes = 10

    key = jax.random.PRNGKey(0)
    k_x, k_p = jax.random.split(key)

    # Input: [B, 3, hidden_size, patch, patch] -> flattens to 3*hidden*patch*patch
    x = jax.random.normal(
        k_x, (batch, 3, hidden_size, patch_size, patch_size), dtype=jnp.float32)

    weight, bias = init_classifier_params(k_p, hidden_size, patch_size, num_classes)

    out = classifier_forward(x, weight, bias)
    out = jax.block_until_ready(out)

    # Reference check against plain JAX (same math as torch Linear).
    ref = x.reshape(batch, -1) @ weight.T + bias
    assert out.shape == (batch, num_classes)
    assert jnp.allclose(out, ref, atol=1e-5, rtol=1e-5)

    # TODO(synk): self.dropout exists in the module but is never applied in
    # forward(), so it is intentionally not implemented.

    print("KERNEL_OK")
</pallas_src>

<mosaic_0001>
module attributes {stable_mosaic.version = 11 : i64} {
  func.func @_linear_kernel_single_k(%arg0: i32, %arg1: memref<8x384xf32, #tpu.memory_space<vmem>>, %arg2: memref<128x384xf32, #tpu.memory_space<vmem>>, %arg3: memref<1x128xf32, #tpu.memory_space<vmem>>, %arg4: memref<8x128xf32, #tpu.memory_space<vmem>>) attributes {dimension_semantics = [#tpu.dimension_semantics<parallel>], iteration_bounds = array<i64: 1>, scalar_prefetch = 0 : i64, scratch_operands = 0 : i64, tpu.core_type = #tpu.core_type<tc>, window_params = [{transform_indices = @transform_0, window_bounds = array<i64: 8, 384>}, {pipeline_mode = #tpu.pipeline_mode<synchronous>, transform_indices = @transform_1, window_bounds = array<i64: 128, 384>}, {pipeline_mode = #tpu.pipeline_mode<synchronous>, transform_indices = @transform_2, window_bounds = array<i64: 1, 128>}, {transform_indices = @transform_3, window_bounds = array<i64: 8, 128>}]} {
    %c0 = arith.constant 0 : index
    %c0_0 = arith.constant 0 : index
    %0 = vector.load %arg1[%c0, %c0_0] : memref<8x384xf32, #tpu.memory_space<vmem>>, vector<8x384xf32>
    %c0_1 = arith.constant 0 : index
    %c0_2 = arith.constant 0 : index
    %1 = vector.load %arg2[%c0_1, %c0_2] : memref<128x384xf32, #tpu.memory_space<vmem>>, vector<128x384xf32>
    %cst = arith.constant dense<0.000000e+00> : vector<8x128xf32>
    %2 = tpu.matmul %0, %1, %cst {dimension_numbers = #tpu.dot_dimension_numbers<[1], [1], [0], [0], [0, 0, 1, 0], [], []>} : vector<8x384xf32>, vector<128x384xf32>, vector<8x128xf32> -> vector<8x128xf32>
    %c0_3 = arith.constant 0 : index
    %c0_4 = arith.constant 0 : index
    %3 = vector.load %arg3[%c0_3, %c0_4] : memref<1x128xf32, #tpu.memory_space<vmem>>, vector<1x128xf32>
    %4 = vector.broadcast %3 : vector<1x128xf32> to vector<8x128xf32>
    %5 = arith.addf %2, %4 : vector<8x128xf32>
    %c0_5 = arith.constant 0 : index
    %c0_6 = arith.constant 0 : index
    %6 = vector.load %arg4[%c0_5, %c0_6] : memref<8x128xf32, #tpu.memory_space<vmem>>, vector<8x128xf32>
    tpu.vector_store %arg4[%c0_5, %c0_6], %5 {strides = array<i32>} : memref<8x128xf32, #tpu.memory_space<vmem>>, vector<8x128xf32>,
    return
  }
  func.func @transform_0(%arg0: i32) -> (i32, i32) {
    %c0_i32 = arith.constant 0 : i32
    %c0_i32_0 = arith.constant 0 : i32
    return %arg0, %c0_i32 : i32, i32
  }
  func.func @transform_1(%arg0: i32) -> (i32, i32) {
    %c0_i32 = arith.constant 0 : i32
    %c0_i32_0 = arith.constant 0 : i32
    %c0_i32_1 = arith.constant 0 : i32
    return %c0_i32, %c0_i32_0 : i32, i32
  }
  func.func @transform_2(%arg0: i32) -> (i32, i32) {
    %c0_i32 = arith.constant 0 : i32
    %c0_i32_0 = arith.constant 0 : i32
    %c0_i32_1 = arith.constant 0 : i32
    return %c0_i32, %c0_i32_0 : i32, i32
  }
  func.func @transform_3(%arg0: i32) -> (i32, i32) {
    %c0_i32 = arith.constant 0 : i32
    %c0_i32_0 = arith.constant 0 : i32
    return %arg0, %c0_i32 : i32, i32
  }
}

</mosaic_0001>

<bundles_post_ra>
// kernel: tpu_custom_call.1
= control target key start
LH: loop header
LB: loop body
LE: loop exit
PB: predicated region body
PF: predicated region fallthrough
CT: control target
= control target key end

     0   :  { %8 = vsyncpa [#allocation3], 0  ;;  %s529_s0 = inlined_call_operand.hbm [shape: f32[8,384], index: 0, kind: input, shape index: {}]   ;;  %s530_s1 = inlined_call_operand.hbm [shape: f32[128,384], index: 1, kind: input, shape index: {}]   ;;  %s531_s2 = inlined_call_operand.vmem [shape: f32[1,128], index: 2, kind: input, shape index: {}]   ;;  %s532_s3 = inlined_call_operand.hbm [shape: f32[8,128], index: 3, kind: output, shape index: {}]  }
   0x1   :  { %9 = vsyncpa [#allocation6], 0 }
   0x2   :  { %10 = vsyncpa [#allocation4], 0  ;;  %s447_s12 = smov [#allocation2]   ;;  %s448_s14 = smov [#allocation5]  }
   0x3   :  { %s17_s13 = sshll.u32 %s447_s12, 4  ;;  %s26_s15 = sshll.u32 %s448_s14, 4  ;;  %s18_s13 = int_to_ptr.vmem [resolvable:$true] %s17_s13  ;;  %s475_s15 = int_to_ptr.vmem [resolvable:$true] %s26_s15 }
   0x4   :  { %s375_s18 = scalar_lea.hbm %s529_s0, 384 }
   0x5   :  { %p376_p0 = scmp.ne.s32.totalorder %s529_s0, %s375_s18  ;;  %p379_p1 = scmp.lt.u32.totalorder %s375_s18, %s529_s0 }
   0x7   :  { %p381_p2 = pnand %p379_p1, %p376_p0 }
   0x9   :  { %384 = shalt.err (!%p381_p2)
}
   0xa   :  { %s385_s23 = scalar_lea.vmem %s18_s13, 384  ;;  %p390_p4 = scmp.lt.s32.totalorder %s18_s13, %s18_s13 }
   0xb   :  { %p386_p3 = scmp.ne.s32.totalorder %s18_s13, %s385_s23  ;;  %p391_p5 = scmp.lt.s32.totalorder %s385_s23, %s385_s23 }
   0xd   :  { %p392_p6 = por %p391_p5, %p390_p4 }
   0xf   :  { %p393_p7 = pnand %p392_p6, %p386_p3 }
  0x11   :  { %396 = shalt.err (!%p393_p7)
}
  0x12   :  { %20 = dma.hbm_to_vmem [thread:$0]  %s529_s0, 384, %s18_s13, [#allocation3]  }
  0x13   :  { %s397_s28 = scalar_lea.hbm %s530_s1, 6144 }
  0x14   :  { %p398_p8 = scmp.ne.s32.totalorder %s530_s1, %s397_s28  ;;  %p401_p9 = scmp.lt.u32.totalorder %s397_s28, %s530_s1 }
  0x16   :  { %p403_p10 = pnand %p401_p9, %p398_p8 }
  0x18   :  { %406 = shalt.err (!%p403_p10)
}
  0x19   :  { %s407_s6 = scalar_lea.vmem %s475_s15, 6144  ;;  %p412_p12 = scmp.lt.s32.totalorder %s475_s15, %s475_s15 }
  0x1a   :  { %p408_p11 = scmp.ne.s32.totalorder %s475_s15, %s407_s6  ;;  %p413_p13 = scmp.lt.s32.totalorder %s407_s6, %s407_s6 }
  0x1c   :  { %p414_p0 = por %p413_p13, %p412_p12 }
  0x1e   :  { %p415_p1 = pnand %p414_p0, %p408_p11 }
  0x20   :  { %418 = shalt.err (!%p415_p1)
}
  0x21   :  { %s449_s0 = smov 384   ;;  %s450_s7 = smov 24  }
  0x22   :  { %32 = dma.hbm_to_vmem [thread:$0]  %s530_s1, 6144, %s475_s15, [#allocation6], %s449_s0, %s449_s0, %s450_s7  }
  0x23   :  { %441 = dma.done.wait [#allocation3], 384  }
  0x24   :  { %442 = vsyncadd [#allocation3], 4294966912 }
  0x25   :  { %443 = dma.done.wait [#allocation6], 6144  }
  0x26   :  { %444 = vsyncadd [#allocation6], 4294961152  ;;  %v451_v0 = vmov 0.0|0.0   ;;  %vm452_vm0 = vmmov 0   ;;  %v453_v1 = vmov 0.0   ;;  %v45_v2 = vld [vmem:[#allocation5 + $0x8] sm:$0xff] }
  0x27   :  { %341 = vmatprep.subr.bf16.mxu0 %v451_v0  ;;  %306 = vmatprep.mubr.msk.f32.mxu0 %vm452_vm0, %v453_v1  ;;  %v48_v3 = vld [vmem:[#allocation5 + $0x20] sm:$0xff]  ;;  %v47_v6 = vld [vmem:[#allocation5 + $0x18] sm:$0xff]  ;;  %v46_v7 = vld [vmem:[#allocation5 + $0x10] sm:$0xff]  ;;  %s454_s11 = smov [#allocation7]  }
  0x28   :  { %v44_v4 = vld [vmem:[#allocation5] sm:$0xff]  ;;  %v309_v5 = vpack.c.bf16 %v48_v3, %v45_v2  ;;  %v49_v8 = vld [vmem:[#allocation5 + $0x28] sm:$0xff]  ;;  %v51_v11 = vld [vmem:[#allocation5 + $0x38] sm:$0xff]  ;;  %s246_s12 = sshll.u32 %s454_s11, 4  ;;  %s247_s12 = int_to_ptr.vmem [resolvable:$true] %s246_s12 }
  0x29   :  { %v311_v9 = vpack.c.bf16 %v47_v6, %v44_v4  ;;  %v342_v10 = vpack.c.bf16 %v49_v8, %v46_v7  ;;  %v54_v12 = vld [vmem:[#allocation5 + $0x50] sm:$0xff]  ;;  %v53_v15 = vld [vmem:[#allocation5 + $0x48] sm:$0xff]  ;;  %v52_v16 = vld [vmem:[#allocation5 + $0x40] sm:$0xff]  ;;  %s419_s13 = scalar_lea.vmem %s247_s12, 128  ;;  %p424_p3 = scmp.lt.s32.totalorder %s247_s12, %s247_s12 }
  0x2a   :  { %310 = vmatprep.subr.bf16.mxu1 %v309_v5  ;;  %v313_v13 = vpack.c.bf16 %v54_v12, %v51_v11  ;;  %v50_v14 = vld [vmem:[#allocation5 + $0x30] sm:$0xff]  ;;  %v55_v17 = vld [vmem:[#allocation5 + $0x58] sm:$0xff]  ;;  %v57_v18 = vld [vmem:[#allocation5 + $0x68] sm:$0xff]  ;;  %p420_p2 = scmp.ne.s32.totalorder %s247_s12, %s419_s13  ;;  %p425_p4 = scmp.lt.s32.totalorder %s419_s13, %s419_s13 }
  0x2b   :  { %312 = vmatpush1.bf16.xpose.msra.mxu1 %v311_v9  ;;  %343 = vmatpush3.bf16.xpose.msra.mxu0 %v342_v10  ;;  %v60_v19 = vld [vmem:[#allocation5 + $0x80] sm:$0xff]  ;;  %v315_v20 = vpack.c.bf16 %v53_v15, %v50_v14  ;;  %v345_v21 = vpack.c.bf16 %v55_v17, %v52_v16  ;;  %v59_v24 = vld [vmem:[#allocation5 + $0x78] sm:$0xff]  ;;  %v58_v25 = vld [vmem:[#allocation5 + $0x70] sm:$0xff] }
  0x2c   :  { %314 = vmatprep.subr.bf16.mxu1 %v313_v13  ;;  %344 = vmatprep.subr.bf16.mxu0 %v451_v0  ;;  %v317_v22 = vpack.c.bf16 %v60_v19, %v57_v18  ;;  %v56_v23 = vld [vmem:[#allocation5 + $0x60] sm:$0xff]  ;;  %v61_v26 = vld [vmem:[#allocation5 + $0x88] sm:$0xff]  ;;  %v63_v27 = vld [vmem:[#allocation5 + $0x98] sm:$0xff]  ;;  %p426_p5 = por %p425_p4, %p424_p3 }
  0x2d   :  { %v66_v28 = vld [vmem:[#allocation5 + $0xb0] sm:$0xff]  ;;  %v319_v29 = vpack.c.bf16 %v59_v24, %v56_v23  ;;  %v348_v30 = vpack.c.bf16 %v61_v26, %v58_v25  ;;  %v65_v34 = vld [vmem:[#allocation5 + $0xa8] sm:$0xff]  ;;  %v64_v35 = vld [vmem:[#allocation5 + $0xa0] sm:$0xff] }
  0x2e   :  { %v42_v31 = vld [vmem:[#allocation2 + $0x8] sm:$0xff]  ;;  %v321_v32 = vpack.c.bf16 %v66_v28, %v63_v27  ;;  %v67_v36 = vld [vmem:[#allocation5 + $0xb8] sm:$0xff]  ;;  %v69_v37 = vld [vmem:[#allocation5 + $0xc8] sm:$0xff]  ;;  %p427_p6 = pnand %p426_p5, %p420_p2 }
  0x2f   :  { %163 = vmatprep.mubr.f32.mxu1 %v42_v31  ;;  %v62_v33 = vld [vmem:[#allocation5 + $0x90] sm:$0xff]  ;;  %v72_v38 = vld [vmem:[#allocation5 + $0xe0] sm:$0xff]  ;;  %v351_v40 = vpack.c.bf16 %v67_v36, %v64_v35  ;;  %v71_v43 = vld [vmem:[#allocation5 + $0xd8] sm:$0xff] }
  0x30   :  { %v323_v39 = vpack.c.bf16 %v65_v34, %v62_v33  ;;  %v325_v41 = vpack.c.bf16 %v72_v38, %v69_v37  ;;  %v68_v42 = vld [vmem:[#allocation5 + $0xc0] sm:$0xff]  ;;  %v70_v44 = vld [vmem:[#allocation5 + $0xd0] sm:$0xff]  ;;  %v73_v45 = vld [vmem:[#allocation5 + $0xe8] sm:$0xff] }
  0x31   :  { %v75_v46 = vld [vmem:[#allocation5 + $0xf8] sm:$0xff]  ;;  %v78_v47 = vld [vmem:[#allocation5 + $0x110] sm:$0xff]  ;;  %v327_v48 = vpack.c.bf16 %v71_v43, %v68_v42  ;;  %v354_v49 = vpack.c.bf16 %v73_v45, %v70_v44  ;;  %v77_v52 = vld [vmem:[#allocation5 + $0x108] sm:$0xff] }
  0x32   :  { %v329_v50 = vpack.c.bf16 %v78_v47, %v75_v46  ;;  %v74_v51 = vld [vmem:[#allocation5 + $0xf0] sm:$0xff]  ;;  %v76_v53 = vld [vmem:[#allocation5 + $0x100] sm:$0xff]  ;;  %v79_v54 = vld [vmem:[#allocation5 + $0x118] sm:$0xff] }
  0x33   :  { %316 = vmatpush1.bf16.xpose.msra.mxu1 %v315_v20  ;;  %346 = vmatpush3.bf16.xpose.msra.mxu0 %v345_v21  ;;  %v81_v55 = vld [vmem:[#allocation5 + $0x128] sm:$0xff]  ;;  %v84_v56 = vld [vmem:[#allocation5 + $0x140] sm:$0xff]  ;;  %v331_v57 = vpack.c.bf16 %v77_v52, %v74_v51  ;;  %v357_v58 = vpack.c.bf16 %v79_v54, %v76_v53  ;;  %v83_v61 = vld [vmem:[#allocation5 + $0x138] sm:$0xff] }
  0x34   :  { %318 = vmatprep.subr.bf16.mxu1 %v317_v22  ;;  %347 = vmatprep.subr.bf16.mxu0 %v451_v0  ;;  %v333_v59 = vpack.c.bf16 %v84_v56, %v81_v55  ;;  %v80_v60 = vld [vmem:[#allocation5 + $0x120] sm:$0xff]  ;;  %v82_v62 = vld [vmem:[#allocation5 + $0x130] sm:$0xff]  ;;  %v85_v63 = vld [vmem:[#allocation5 + $0x148] sm:$0xff] }
  0x35   :  { %v87_v1 = vld [vmem:[#allocation5 + $0x158] sm:$0xff]  ;;  %v90_v2 = vld [vmem:[#allocation5 + $0x170] sm:$0xff]  ;;  %v335_v3 = vpack.c.bf16 %v83_v61, %v80_v60  ;;  %v360_v4 = vpack.c.bf16 %v85_v63, %v82_v62  ;;  %v89_v7 = vld [vmem:[#allocation5 + $0x168] sm:$0xff] }
  0x36   :  { %v337_v5 = vpack.c.bf16 %v90_v2, %v87_v1  ;;  %v86_v6 = vld [vmem:[#allocation5 + $0x150] sm:$0xff]  ;;  %v88_v8 = vld [vmem:[#allocation5 + $0x160] sm:$0xff]  ;;  %v91_v9 = vld [vmem:[#allocation5 + $0x178] sm:$0xff] }
  0x37   :  { %v339_v10 = vpack.c.bf16 %v89_v7, %v86_v6  ;;  %v363_v11 = vpack.c.bf16 %v91_v9, %v88_v8  ;;  %v41_v12 = vld [vmem:[#allocation2] sm:$0xff]  ;;  %v43_v13 = vld [vmem:[#allocation2 + $0x10] sm:$0xff] }
  0x38   :  { %v256_v14 = vld [vmem:[%s531_s2] ss:$0 sm:$0xff] }
  0x3b   :  { %320 = vmatpush1.bf16.xpose.msra.mxu1 %v319_v29  ;;  %349 = vmatpush3.bf16.xpose.msra.mxu0 %v348_v30 }
  0x3c   :  { %322 = vmatprep.subr.bf16.mxu1 %v321_v32  ;;  %350 = vmatprep.subr.bf16.mxu0 %v451_v0 }
  0x43   :  { %324 = vmatpush1.bf16.xpose.msra.mxu1 %v323_v39  ;;  %352 = vmatpush3.bf16.xpose.msra.mxu0 %v351_v40 }
  0x44   :  { %326 = vmatprep.subr.bf16.mxu1 %v325_v41  ;;  %353 = vmatprep.subr.bf16.mxu0 %v451_v0 }
  0x4b   :  { %328 = vmatpush1.bf16.xpose.msra.mxu1 %v327_v48  ;;  %355 = vmatpush3.bf16.xpose.msra.mxu0 %v354_v49 }
  0x4c   :  { %330 = vmatprep.subr.bf16.mxu1 %v329_v50  ;;  %356 = vmatprep.subr.bf16.mxu0 %v451_v0 }
  0x53   :  { %332 = vmatpush1.bf16.xpose.msra.mxu1 %v331_v57  ;;  %358 = vmatpush3.bf16.xpose.msra.mxu0 %v357_v58 }
  0x54   :  { %334 = vmatprep.subr.bf16.mxu1 %v333_v59  ;;  %359 = vmatprep.subr.bf16.mxu0 %v451_v0 }
  0x5b   :  { %336 = vmatpush1.bf16.xpose.msra.mxu1 %v335_v3  ;;  %361 = vmatpush3.bf16.xpose.msra.mxu0 %v360_v4 }
  0x5c   :  { %338 = vmatprep.subr.bf16.mxu1 %v337_v5  ;;  %362 = vmatprep.subr.bf16.mxu0 %v451_v0 }
  0x63   :  { %340 = vmatpush1.bf16.xpose.msra.mxu1 %v339_v10  ;;  %364 = vmatpush3.bf16.xpose.msra.mxu0 %v363_v11 }
  0x6a   :  { %164 = vmatmul.mubr.f32.vlgmr.msra.gmra.mrb[0].mxu1 %v41_v12  ;;  %307 = vmatmul.mubr.f32.vlgmr.msra.gmra.mrb[0].mxu0 %v43_v13 }
 0x13d   :  { %v165_v15 = vpop.f32.mrb[0].mxu1  ;;  %v235_v16 = vpop.f32.mrb[0].mxu0 }
 0x13e   :  { %v166_v17 = vadd.f32 %v256_v14, %v165_v15  ;;  %v167_v0 = vpop.f32.mrb[1].mxu1  ;;  %v308_v18 = vpop.f32.mrb[1].mxu0 }
 0x140   :  { %v236_v19 = vadd.f32 %v235_v16, %v166_v17 }
 0x142   :  { %239 = vst [vmem:[#allocation7] sm:$0xff] %v236_v19 }
 0x143   :  { %430 = shalt.err (!%p427_p6)
}
 0x144   :  { %s431_s2 = scalar_lea.hbm %s532_s3, 128 }
 0x145   :  { %p432_p7 = scmp.ne.s32.totalorder %s532_s3, %s431_s2  ;;  %p435_p8 = scmp.lt.u32.totalorder %s431_s2, %s532_s3 }
 0x147   :  { %p437_p9 = pnand %p435_p8, %p432_p7 }
 0x149   :  { %440 = shalt.err (!%p437_p9)
}
 0x14a   :  { %249 = dma.vmem_to_hbm [thread:$0]  %s247_s12, 128, %s532_s3, [#allocation4]  }
 0x14b   :  { %445 = dma.done.wait [#allocation4], 128  }
 0x14c   :  { %446 = vsyncadd [#allocation4], 4294967168 }
 0x14d   :  { %253 = vsyncpa [#allocation3], 1 }
 0x14e   :  { %254 = vsyncpa [#allocation6], 1 }
 0x14f   :  { %255 = vsyncpa [#allocation4], 1 }

</bundles_post_ra>
